<compile_context>
chip_gen: v7x
topology: tpu7x:2x2x1
jax: 0.10.0
libtpu: 0.0.40
codegen_flags: <defaults>
</compile_context>

<pallas_src>
import jax
import jax.numpy as jnp
from jax.experimental import pallas as pl
from jax.experimental.pallas import tpu as pltpu


def _round_up(x, m):
    return (x + m - 1) // m * m


def generator_kernel(x_ref, w1_ref, b1_ref, w2_ref, b2_ref, w3_ref, b3_ref,
                     o_ref):
    # fc1 + ReLU.  x arrives f32; cast to bf16 here (hides in VPU slots) so
    # the HBM stream of x stays 4 B/elem.  f32 accumulation on the MXU.
    x = x_ref[...].astype(w1_ref.dtype)
    h1 = jnp.dot(x, w1_ref[...], preferred_element_type=jnp.float32)
    h1 = jnp.maximum(h1 + b1_ref[...], 0.0)

    # TODO(synk): F.dropout(training=True) is stochastic; implemented as
    # identity (eval mode) here.

    # fc2 + ReLU
    h2 = jnp.dot(h1.astype(w2_ref.dtype), w2_ref[...],
                 preferred_element_type=jnp.float32)
    h2 = jnp.maximum(h2 + b2_ref[...], 0.0)

    # fc3 + Sigmoid (epilogue in f32; output stored bf16, lane-dense)
    h3 = jnp.dot(h2.astype(w3_ref.dtype), w3_ref[...],
                 preferred_element_type=jnp.float32)
    o_ref[...] = jax.nn.sigmoid(h3 + b3_ref[...]).astype(o_ref.dtype)


def prepare_params(params, *, compute_dtype=jnp.bfloat16):
    """Pad feature dims to multiples of 128 and cast weights to bf16 ONCE.

    Padding is numerically inert (zero weight rows/cols + zero bias ->
    zero / sigmoid(0) activations that are sliced off).
    """
    w1, b1 = params["w1"], params["b1"]
    w2, b2 = params["w2"], params["b2"]
    w3, b3 = params["w3"], params["b3"]
    d_in, hidden = w1.shape
    out_dim = w3.shape[1]

    d_in_p = _round_up(d_in, 128)
    hid_p = _round_up(hidden, 128)
    out_p = _round_up(out_dim, 128)

    def pad2(a, rows, cols):
        return jnp.pad(a, ((0, rows - a.shape[0]), (0, cols - a.shape[1])))

    return dict(
        w1=pad2(w1, d_in_p, hid_p).astype(compute_dtype),
        b1=pad2(b1, 1, hid_p).astype(jnp.float32),
        w2=pad2(w2, hid_p, hid_p).astype(compute_dtype),
        b2=pad2(b2, 1, hid_p).astype(jnp.float32),
        w3=pad2(w3, hid_p, out_p).astype(compute_dtype),
        b3=pad2(b3, 1, out_p).astype(jnp.float32),
        d_in=d_in, d_in_p=d_in_p, hid_p=hid_p,
        out_dim=out_dim, out_p=out_p,
        compute_dtype=compute_dtype,
    )


def generator_forward(x_nchw, prep, *, block_batch=1024):
    """x_nchw: (N, C, H, W) float32.  prep: output of prepare_params()."""
    n = x_nchw.shape[0]
    x2d = x_nchw.reshape(n, -1)                          # _flatten
    d_in = x2d.shape[1]
    assert d_in == prep["d_in"], (d_in, prep["d_in"])

    d_in_p, hid_p, out_p = prep["d_in_p"], prep["hid_p"], prep["out_p"]
    out_dim = prep["out_dim"]
    compute_dtype = prep["compute_dtype"]

    # Pad batch only to a multiple of 8 sublanes (NOT to a multiple of tb);
    # Pallas masks the boundary block.  x stays f32 — no wrapper cast pass.
    n_p8 = _round_up(n, 8)
    if n_p8 != n or d_in_p != d_in:
        x2d = jnp.pad(x2d, ((0, n_p8 - n), (0, d_in_p - d_in)))

    # Batch tile: big (fewer ~0.35us grid steps) but capped at ~half the
    # batch so v7x's two TensorCores both get a parallel slice.
    half = _round_up(pl.cdiv(n_p8, 2), 8)
    tb = max(8, min(block_batch, half))
    grid = (pl.cdiv(n_p8, tb),)

    w1p, b1p = prep["w1"], prep["b1"]
    w2p, b2p = prep["w2"], prep["b2"]
    w3p, b3p = prep["w3"], prep["b3"]

    cd_bytes = jnp.dtype(compute_dtype).itemsize
    flops = 2 * n_p8 * (d_in_p * hid_p + hid_p * hid_p + hid_p * out_p)
    bytes_accessed = (
        n_p8 * d_in_p * 4                                  # x (f32 in HBM)
        + (w1p.size + w2p.size + w3p.size) * cd_bytes      # bf16 weights
        + (b1p.size + b2p.size + b3p.size) * 4             # f32 biases
        + n_p8 * out_p * cd_bytes)                         # bf16 output

    def run(single_buffer_weights):
        kw = ({"pipeline_mode": pl.Buffered(1)}
              if single_buffer_weights else {})

        def const_spec(shape):
            # Constant index_map -> VMEM-resident across all grid steps.
            return pl.BlockSpec(shape, lambda i: (0, 0), **kw)

        return pl.pallas_call(
            generator_kernel,
            out_shape=jax.ShapeDtypeStruct((n_p8, out_p), compute_dtype),
            grid_spec=pltpu.PrefetchScalarGridSpec(
                num_scalar_prefetch=0,
                grid=grid,
                in_specs=[
                    pl.BlockSpec((tb, d_in_p), lambda i: (i, 0)),  # x tile
                    const_spec((d_in_p, hid_p)),                   # w1
                    const_spec((1, hid_p)),                        # b1
                    const_spec((hid_p, hid_p)),                    # w2
                    const_spec((1, hid_p)),                        # b2
                    const_spec((hid_p, out_p)),                    # w3
                    const_spec((1, out_p)),                        # b3
                ],
                out_specs=pl.BlockSpec((tb, out_p), lambda i: (i, 0)),
            ),
            compiler_params=pltpu.CompilerParams(
                dimension_semantics=("parallel",)),
            cost_estimate=pl.CostEstimate(
                flops=flops,
                transcendentals=n_p8 * out_p,
                bytes_accessed=bytes_accessed),
        )(x2d, w1p, b1p, w2p, b2p, w3p, b3p)

    try:
        out_padded = jax.block_until_ready(run(True))
    except Exception:
        # Fallback if this JAX build rejects pipeline_mode on top-level specs.
        out_padded = jax.block_until_ready(run(False))

    # TODO(synk): for a fused consumer, keep the padded bf16 slab and fuse the
    # column slice downstream; here we slice + upcast the tiny result.
    return out_padded[:n, :out_dim].astype(jnp.float32)


def init_params(key, in_channels, hidden, out_channels):
    """Deterministic init.  Weights stored transposed: (in, out)."""
    ks = jax.random.split(key, 6)

    def linear(kw, kb, fan_in, fan_out):
        bound = 1.0 / jnp.sqrt(fan_in)
        w_t = jax.random.uniform(kw, (fan_in, fan_out), jnp.float32,
                                 -bound, bound)
        b = jax.random.uniform(kb, (1, fan_out), jnp.float32, -bound, bound)
        return w_t, b

    w1, b1 = linear(ks[0], ks[1], in_channels, hidden)
    w2, b2 = linear(ks[2], ks[3], hidden, hidden)
    w3, b3 = linear(ks[4], ks[5], hidden, out_channels)
    return dict(w1=w1, b1=b1, w2=w2, b2=b2, w3=w3, b3=b3)


if __name__ == "__main__":
    key = jax.random.PRNGKey(0)
    k_x, k_p = jax.random.split(key)

    # Small shapes consistent with the module: N=2, C=4, H=W=16.
    N, C, H, W = 2, 4, 16, 16
    in_channels = C * H * W          # 1024 (flattened feature dim)
    hidden = 100
    out_channels = 64

    x = jax.random.normal(k_x, (N, C, H, W), jnp.float32)
    params = init_params(k_p, in_channels, hidden, out_channels)
    prep = prepare_params(params)

    out = generator_forward(x, prep)
    out = jax.block_until_ready(out)

    # Pure-JAX reference of the same math (bf16 operands, f32 accumulation).
    cd = jnp.bfloat16
    x2d = x.reshape(N, -1)
    h1 = jnp.maximum(
        jnp.dot(x2d.astype(cd), params["w1"].astype(cd),
                preferred_element_type=jnp.float32) + params["b1"], 0.0)
    h2 = jnp.maximum(
        jnp.dot(h1.astype(cd), params["w2"].astype(cd),
                preferred_element_type=jnp.float32) + params["b2"], 0.0)
    ref = jax.nn.sigmoid(
        jnp.dot(h2.astype(cd), params["w3"].astype(cd),
                preferred_element_type=jnp.float32) + params["b3"])

    assert out.shape == (N, out_channels), out.shape
    assert jnp.all(jnp.isfinite(out))
    # Kernel output is stored in bf16 (perf), so allow ~1 bf16 ulp near 1.0.
    err = float(jnp.max(jnp.abs(out - ref)))
    assert err < 1e-2, err

    print("KERNEL_OK")
</pallas_src>

<mosaic_0001>
module attributes {stable_mosaic.version = 11 : i64} {
  func.func @generator_kernel(%arg0: i32, %arg1: memref<8x1024xf32, #tpu.memory_space<vmem>>, %arg2: memref<1024x128xbf16, #tpu.memory_space<vmem>>, %arg3: memref<1x128xf32, #tpu.memory_space<vmem>>, %arg4: memref<128x128xbf16, #tpu.memory_space<vmem>>, %arg5: memref<1x128xf32, #tpu.memory_space<vmem>>, %arg6: memref<128x128xbf16, #tpu.memory_space<vmem>>, %arg7: memref<1x128xf32, #tpu.memory_space<vmem>>, %arg8: memref<8x128xbf16, #tpu.memory_space<vmem>>) attributes {dimension_semantics = [#tpu.dimension_semantics<parallel>], iteration_bounds = array<i64: 1>, scalar_prefetch = 0 : i64, scratch_operands = 0 : i64, tpu.core_type = #tpu.core_type<tc>, window_params = [{transform_indices = @transform_0, window_bounds = array<i64: 8, 1024>}, {pipeline_mode = #tpu.pipeline_mode<synchronous>, transform_indices = @transform_1, window_bounds = array<i64: 1024, 128>}, {pipeline_mode = #tpu.pipeline_mode<synchronous>, transform_indices = @transform_2, window_bounds = array<i64: 1, 128>}, {pipeline_mode = #tpu.pipeline_mode<synchronous>, transform_indices = @transform_3, window_bounds = array<i64: 128, 128>}, {pipeline_mode = #tpu.pipeline_mode<synchronous>, transform_indices = @transform_4, window_bounds = array<i64: 1, 128>}, {pipeline_mode = #tpu.pipeline_mode<synchronous>, transform_indices = @transform_5, window_bounds = array<i64: 128, 128>}, {pipeline_mode = #tpu.pipeline_mode<synchronous>, transform_indices = @transform_6, window_bounds = array<i64: 1, 128>}, {transform_indices = @transform_7, window_bounds = array<i64: 8, 128>}]} {
    %c0 = arith.constant 0 : index
    %c0_0 = arith.constant 0 : index
    %0 = vector.load %arg1[%c0, %c0_0] : memref<8x1024xf32, #tpu.memory_space<vmem>>, vector<8x1024xf32>
    %1 = arith.truncf %0 : vector<8x1024xf32> to vector<8x1024xbf16>
    %c0_1 = arith.constant 0 : index
    %c0_2 = arith.constant 0 : index
    %2 = vector.load %arg2[%c0_1, %c0_2] : memref<1024x128xbf16, #tpu.memory_space<vmem>>, vector<1024x128xbf16>
    %cst = arith.constant dense<0.000000e+00> : vector<8x128xf32>
    %3 = tpu.matmul %1, %2, %cst {dimension_numbers = #tpu.dot_dimension_numbers<[1], [0], [0], [1], [0, 0, 1, 1], [], []>} : vector<8x1024xbf16>, vector<1024x128xbf16>, vector<8x128xf32> -> vector<8x128xf32>
    %c0_3 = arith.constant 0 : index
    %c0_4 = arith.constant 0 : index
    %4 = vector.load %arg3[%c0_3, %c0_4] : memref<1x128xf32, #tpu.memory_space<vmem>>, vector<1x128xf32>
    %5 = vector.broadcast %4 : vector<1x128xf32> to vector<8x128xf32>
    %6 = arith.addf %3, %5 : vector<8x128xf32>
    %cst_5 = arith.constant 0.000000e+00 : f32
    %7 = vector.broadcast %cst_5 : f32 to vector<8x128xf32>
    %8 = arith.maximumf %6, %7 : vector<8x128xf32>
    %9 = arith.truncf %8 : vector<8x128xf32> to vector<8x128xbf16>
    %c0_6 = arith.constant 0 : index
    %c0_7 = arith.constant 0 : index
    %10 = vector.load %arg4[%c0_6, %c0_7] : memref<128x128xbf16, #tpu.memory_space<vmem>>, vector<128x128xbf16>
    %cst_8 = arith.constant dense<0.000000e+00> : vector<8x128xf32>
    %11 = tpu.matmul %9, %10, %cst_8 {dimension_numbers = #tpu.dot_dimension_numbers<[1], [0], [0], [1], [0, 0, 1, 1], [], []>} : vector<8x128xbf16>, vector<128x128xbf16>, vector<8x128xf32> -> vector<8x128xf32>
    %c0_9 = arith.constant 0 : index
    %c0_10 = arith.constant 0 : index
    %12 = vector.load %arg5[%c0_9, %c0_10] : memref<1x128xf32, #tpu.memory_space<vmem>>, vector<1x128xf32>
    %13 = vector.broadcast %12 : vector<1x128xf32> to vector<8x128xf32>
    %14 = arith.addf %11, %13 : vector<8x128xf32>
    %cst_11 = arith.constant 0.000000e+00 : f32
    %15 = vector.broadcast %cst_11 : f32 to vector<8x128xf32>
    %16 = arith.maximumf %14, %15 : vector<8x128xf32>
    %17 = arith.truncf %16 : vector<8x128xf32> to vector<8x128xbf16>
    %c0_12 = arith.constant 0 : index
    %c0_13 = arith.constant 0 : index
    %18 = vector.load %arg6[%c0_12, %c0_13] : memref<128x128xbf16, #tpu.memory_space<vmem>>, vector<128x128xbf16>
    %cst_14 = arith.constant dense<0.000000e+00> : vector<8x128xf32>
    %19 = tpu.matmul %17, %18, %cst_14 {dimension_numbers = #tpu.dot_dimension_numbers<[1], [0], [0], [1], [0, 0, 1, 1], [], []>} : vector<8x128xbf16>, vector<128x128xbf16>, vector<8x128xf32> -> vector<8x128xf32>
    %c0_15 = arith.constant 0 : index
    %c0_16 = arith.constant 0 : index
    %20 = vector.load %arg7[%c0_15, %c0_16] : memref<1x128xf32, #tpu.memory_space<vmem>>, vector<1x128xf32>
    %21 = vector.broadcast %20 : vector<1x128xf32> to vector<8x128xf32>
    %22 = arith.addf %19, %21 : vector<8x128xf32>
    %23 = arith.negf %22 : vector<8x128xf32>
    %24 = math.exp %23 : vector<8x128xf32>
    %cst_17 = arith.constant 1.000000e+00 : f32
    %25 = vector.broadcast %cst_17 : f32 to vector<8x128xf32>
    %26 = arith.addf %25, %24 : vector<8x128xf32>
    %27 = arith.divf %25, %26 : vector<8x128xf32>
    %28 = arith.truncf %27 : vector<8x128xf32> to vector<8x128xbf16>
    %c0_18 = arith.constant 0 : index
    %c0_19 = arith.constant 0 : index
    %29 = vector.load %arg8[%c0_18, %c0_19] : memref<8x128xbf16, #tpu.memory_space<vmem>>, vector<8x128xbf16>
    tpu.vector_store %arg8[%c0_18, %c0_19], %28 {strides = array<i32>} : memref<8x128xbf16, #tpu.memory_space<vmem>>, vector<8x128xbf16>,
    return
  }
  func.func @transform_0(%arg0: i32) -> (i32, i32) {
    %c0_i32 = arith.constant 0 : i32
    %c0_i32_0 = arith.constant 0 : i32
    return %arg0, %c0_i32 : i32, i32
  }
  func.func @transform_1(%arg0: i32) -> (i32, i32) {
    %c0_i32 = arith.constant 0 : i32
    %c0_i32_0 = arith.constant 0 : i32
    %c0_i32_1 = arith.constant 0 : i32
    return %c0_i32, %c0_i32_0 : i32, i32
  }
  func.func @transform_2(%arg0: i32) -> (i32, i32) {
    %c0_i32 = arith.constant 0 : i32
    %c0_i32_0 = arith.constant 0 : i32
    %c0_i32_1 = arith.constant 0 : i32
    return %c0_i32, %c0_i32_0 : i32, i32
  }
  func.func @transform_3(%arg0: i32) -> (i32, i32) {
    %c0_i32 = arith.constant 0 : i32
    %c0_i32_0 = arith.constant 0 : i32
    %c0_i32_1 = arith.constant 0 : i32
    return %c0_i32, %c0_i32_0 : i32, i32
  }
  func.func @transform_4(%arg0: i32) -> (i32, i32) {
    %c0_i32 = arith.constant 0 : i32
    %c0_i32_0 = arith.constant 0 : i32
    %c0_i32_1 = arith.constant 0 : i32
    return %c0_i32, %c0_i32_0 : i32, i32
  }
  func.func @transform_5(%arg0: i32) -> (i32, i32) {
    %c0_i32 = arith.constant 0 : i32
    %c0_i32_0 = arith.constant 0 : i32
    %c0_i32_1 = arith.constant 0 : i32
    return %c0_i32, %c0_i32_0 : i32, i32
  }
  func.func @transform_6(%arg0: i32) -> (i32, i32) {
    %c0_i32 = arith.constant 0 : i32
    %c0_i32_0 = arith.constant 0 : i32
    %c0_i32_1 = arith.constant 0 : i32
    return %c0_i32, %c0_i32_0 : i32, i32
  }
  func.func @transform_7(%arg0: i32) -> (i32, i32) {
    %c0_i32 = arith.constant 0 : i32
    %c0_i32_0 = arith.constant 0 : i32
    return %arg0, %c0_i32 : i32, i32
  }
}

module attributes {stable_mosaic.version = 11 : i64} {
  func.func @generator_kernel(%arg0: i32, %arg1: memref<8x1024xf32, #tpu.memory_space<vmem>>, %arg2: memref<1024x128xbf16, #tpu.memory_space<vmem>>, %arg3: memref<1x128xf32, #tpu.memory_space<vmem>>, %arg4: memref<128x128xbf16, #tpu.memory_space<vmem>>, %arg5: memref<1x128xf32, #tpu.memory_space<vmem>>, %arg6: memref<128x128xbf16, #tpu.memory_space<vmem>>, %arg7: memref<1x128xf32, #tpu.memory_space<vmem>>, %arg8: memref<8x128xbf16, #tpu.memory_space<vmem>>) attributes {dimension_semantics = [#tpu.dimension_semantics<parallel>], iteration_bounds = array<i64: 1>, scalar_prefetch = 0 : i64, scratch_operands = 0 : i64, tpu.core_type = #tpu.core_type<tc>, window_params = [{transform_indices = @transform_0, window_bounds = array<i64: 8, 1024>}, {pipeline_mode = #tpu.pipeline_mode<synchronous>, transform_indices = @transform_1, window_bounds = array<i64: 1024, 128>}, {pipeline_mode = #tpu.pipeline_mode<synchronous>, transform_indices = @transform_2, window_bounds = array<i64: 1, 128>}, {pipeline_mode = #tpu.pipeline_mode<synchronous>, transform_indices = @transform_3, window_bounds = array<i64: 128, 128>}, {pipeline_mode = #tpu.pipeline_mode<synchronous>, transform_indices = @transform_4, window_bounds = array<i64: 1, 128>}, {pipeline_mode = #tpu.pipeline_mode<synchronous>, transform_indices = @transform_5, window_bounds = array<i64: 128, 128>}, {pipeline_mode = #tpu.pipeline_mode<synchronous>, transform_indices = @transform_6, window_bounds = array<i64: 1, 128>}, {transform_indices = @transform_7, window_bounds = array<i64: 8, 128>}]} {
    %c0 = arith.constant 0 : index
    %c0_0 = arith.constant 0 : index
    %0 = vector.load %arg1[%c0, %c0_0] : memref<8x1024xf32, #tpu.memory_space<vmem>>, vector<8x1024xf32>
    %1 = arith.truncf %0 : vector<8x1024xf32> to vector<8x1024xbf16>
    %c0_1 = arith.constant 0 : index
    %c0_2 = arith.constant 0 : index
    %2 = vector.load %arg2[%c0_1, %c0_2] : memref<1024x128xbf16, #tpu.memory_space<vmem>>, vector<1024x128xbf16>
    %cst = arith.constant dense<0.000000e+00> : vector<8x128xf32>
    %3 = tpu.matmul %1, %2, %cst {dimension_numbers = #tpu.dot_dimension_numbers<[1], [0], [0], [1], [0, 0, 1, 1], [], []>} : vector<8x1024xbf16>, vector<1024x128xbf16>, vector<8x128xf32> -> vector<8x128xf32>
    %c0_3 = arith.constant 0 : index
    %c0_4 = arith.constant 0 : index
    %4 = vector.load %arg3[%c0_3, %c0_4] : memref<1x128xf32, #tpu.memory_space<vmem>>, vector<1x128xf32>
    %5 = vector.broadcast %4 : vector<1x128xf32> to vector<8x128xf32>
    %6 = arith.addf %3, %5 : vector<8x128xf32>
    %cst_5 = arith.constant 0.000000e+00 : f32
    %7 = vector.broadcast %cst_5 : f32 to vector<8x128xf32>
    %8 = arith.maximumf %6, %7 : vector<8x128xf32>
    %9 = arith.truncf %8 : vector<8x128xf32> to vector<8x128xbf16>
    %c0_6 = arith.constant 0 : index
    %c0_7 = arith.constant 0 : index
    %10 = vector.load %arg4[%c0_6, %c0_7] : memref<128x128xbf16, #tpu.memory_space<vmem>>, vector<128x128xbf16>
    %cst_8 = arith.constant dense<0.000000e+00> : vector<8x128xf32>
    %11 = tpu.matmul %9, %10, %cst_8 {dimension_numbers = #tpu.dot_dimension_numbers<[1], [0], [0], [1], [0, 0, 1, 1], [], []>} : vector<8x128xbf16>, vector<128x128xbf16>, vector<8x128xf32> -> vector<8x128xf32>
    %c0_9 = arith.constant 0 : index
    %c0_10 = arith.constant 0 : index
    %12 = vector.load %arg5[%c0_9, %c0_10] : memref<1x128xf32, #tpu.memory_space<vmem>>, vector<1x128xf32>
    %13 = vector.broadcast %12 : vector<1x128xf32> to vector<8x128xf32>
    %14 = arith.addf %11, %13 : vector<8x128xf32>
    %cst_11 = arith.constant 0.000000e+00 : f32
    %15 = vector.broadcast %cst_11 : f32 to vector<8x128xf32>
    %16 = arith.maximumf %14, %15 : vector<8x128xf32>
    %17 = arith.truncf %16 : vector<8x128xf32> to vector<8x128xbf16>
    %c0_12 = arith.constant 0 : index
    %c0_13 = arith.constant 0 : index
    %18 = vector.load %arg6[%c0_12, %c0_13] : memref<128x128xbf16, #tpu.memory_space<vmem>>, vector<128x128xbf16>
    %cst_14 = arith.constant dense<0.000000e+00> : vector<8x128xf32>
    %19 = tpu.matmul %17, %18, %cst_14 {dimension_numbers = #tpu.dot_dimension_numbers<[1], [0], [0], [1], [0, 0, 1, 1], [], []>} : vector<8x128xbf16>, vector<128x128xbf16>, vector<8x128xf32> -> vector<8x128xf32>
    %c0_15 = arith.constant 0 : index
    %c0_16 = arith.constant 0 : index
    %20 = vector.load %arg7[%c0_15, %c0_16] : memref<1x128xf32, #tpu.memory_space<vmem>>, vector<1x128xf32>
    %21 = vector.broadcast %20 : vector<1x128xf32> to vector<8x128xf32>
    %22 = arith.addf %19, %21 : vector<8x128xf32>
    %23 = arith.negf %22 : vector<8x128xf32>
    %24 = math.exp %23 : vector<8x128xf32>
    %cst_17 = arith.constant 1.000000e+00 : f32
    %25 = vector.broadcast %cst_17 : f32 to vector<8x128xf32>
    %26 = arith.addf %25, %24 : vector<8x128xf32>
    %27 = arith.divf %25, %26 : vector<8x128xf32>
    %28 = arith.truncf %27 : vector<8x128xf32> to vector<8x128xbf16>
    %c0_18 = arith.constant 0 : index
    %c0_19 = arith.constant 0 : index
    %29 = vector.load %arg8[%c0_18, %c0_19] : memref<8x128xbf16, #tpu.memory_space<vmem>>, vector<8x128xbf16>
    tpu.vector_store %arg8[%c0_18, %c0_19], %28 {strides = array<i32>} : memref<8x128xbf16, #tpu.memory_space<vmem>>, vector<8x128xbf16>,
    return
  }
  func.func @transform_0(%arg0: i32) -> (i32, i32) {
    %c0_i32 = arith.constant 0 : i32
    %c0_i32_0 = arith.constant 0 : i32
    return %arg0, %c0_i32 : i32, i32
  }
  func.func @transform_1(%arg0: i32) -> (i32, i32) {
    %c0_i32 = arith.constant 0 : i32
    %c0_i32_0 = arith.constant 0 : i32
    %c0_i32_1 = arith.constant 0 : i32
    return %c0_i32, %c0_i32_0 : i32, i32
  }
  func.func @transform_2(%arg0: i32) -> (i32, i32) {
    %c0_i32 = arith.constant 0 : i32
    %c0_i32_0 = arith.constant 0 : i32
    %c0_i32_1 = arith.constant 0 : i32
    return %c0_i32, %c0_i32_0 : i32, i32
  }
  func.func @transform_3(%arg0: i32) -> (i32, i32) {
    %c0_i32 = arith.constant 0 : i32
    %c0_i32_0 = arith.constant 0 : i32
    %c0_i32_1 = arith.constant 0 : i32
    return %c0_i32, %c0_i32_0 : i32, i32
  }
  func.func @transform_4(%arg0: i32) -> (i32, i32) {
    %c0_i32 = arith.constant 0 : i32
    %c0_i32_0 = arith.constant 0 : i32
    %c0_i32_1 = arith.constant 0 : i32
    return %c0_i32, %c0_i32_0 : i32, i32
  }
  func.func @transform_5(%arg0: i32) -> (i32, i32) {
    %c0_i32 = arith.constant 0 : i32
    %c0_i32_0 = arith.constant 0 : i32
    %c0_i32_1 = arith.constant 0 : i32
    return %c0_i32, %c0_i32_0 : i32, i32
  }
  func.func @transform_6(%arg0: i32) -> (i32, i32) {
    %c0_i32 = arith.constant 0 : i32
    %c0_i32_0 = arith.constant 0 : i32
    %c0_i32_1 = arith.constant 0 : i32
    return %c0_i32, %c0_i32_0 : i32, i32
  }
  func.func @transform_7(%arg0: i32) -> (i32, i32) {
    %c0_i32 = arith.constant 0 : i32
    %c0_i32_0 = arith.constant 0 : i32
    return %arg0, %c0_i32 : i32, i32
  }
}

</mosaic_0001>

<bundles_post_ra>
// kernel: tpu_custom_call.1
= control target key start
LH: loop header
LB: loop body
LE: loop exit
PB: predicated region body
PF: predicated region fallthrough
CT: control target
= control target key end

     0   :  { %12 = vsyncpa [#allocation3], 0  ;;  %s1613_s0 = inlined_call_operand.hbm [shape: f32[8,1024], index: 0, kind: input, shape index: {}]   ;;  %s1614_s1 = inlined_call_operand.hbm [shape: bf16[1024,128], index: 1, kind: input, shape index: {}]   ;;  %s1615_s2 = inlined_call_operand.vmem [shape: f32[1,128], index: 2, kind: input, shape index: {}]   ;;  %s1616_s3 = inlined_call_operand.hbm [shape: bf16[128,128], index: 3, kind: input, shape index: {}]   ;;  %s1617_s4 = inlined_call_operand.vmem [shape: f32[1,128], index: 4, kind: input, shape index: {}]   ;;  %s1618_s5 = inlined_call_operand.hbm [shape: bf16[128,128], index: 5, kind: input, shape index: {}]   ;;  %s1619_s6 = inlined_call_operand.vmem [shape: f32[1,128], index: 6, kind: input, shape index: {}]   ;;  %s1620_s7 = inlined_call_operand.hbm [shape: bf16[8,128], index: 7, kind: output, shape index: {}]  }
   0x1   :  { %13 = vsyncpa [#allocation6], 0 }
   0x2   :  { %14 = vsyncpa [#allocation9], 0 }
   0x3   :  { %15 = vsyncpa [#allocation4], 0  ;;  %s1468_s24 = smov [#allocation5]   ;;  %s1350_s28 = scalar_lea.hbm %s1614_s1, 8192 }
   0x4   :  { %s31_s25 = sshll.u32 %s1468_s24, 4  ;;  %p1351_p0 = scmp.ne.s32.totalorder %s1614_s1, %s1350_s28  ;;  %s32_s25 = int_to_ptr.vmem [resolvable:$true] %s31_s25 }
   0x5   :  { %p1354_p1 = scmp.lt.u32.totalorder %s1350_s28, %s1614_s1 }
   0x7   :  { %p1356_p2 = pnand %p1354_p1, %p1351_p0 }
   0x9   :  { %1359 = shalt.err (!%p1356_p2)
}
   0xa   :  { %s1360_s10 = scalar_lea.vmem %s32_s25, 8192  ;;  %p1365_p4 = scmp.lt.s32.totalorder %s32_s25, %s32_s25 }
   0xb   :  { %p1361_p3 = scmp.ne.s32.totalorder %s32_s25, %s1360_s10  ;;  %p1366_p5 = scmp.lt.s32.totalorder %s1360_s10, %s1360_s10 }
   0xd   :  { %p1367_p6 = por %p1366_p5, %p1365_p4 }
   0xf   :  { %p1368_p7 = pnand %p1367_p6, %p1361_p3 }
  0x11   :  { %1371 = shalt.err (!%p1368_p7)
}
  0x12   :  { %s1469_s11 = smov 64   ;;  %s1470_s12 = smov 4  }
  0x13   :  { %37 = dma.hbm_to_vmem [thread:$0]  %s1614_s1, 8192, %s32_s25, [#allocation6], %s1469_s11, %s1469_s11, %s1470_s12  }
  0x14   :  { %s1471_s15 = smov [#allocation2]   ;;  %s1472_s17 = smov [#allocation7]  }
  0x15   :  { %s22_s16 = sshll.u32 %s1471_s15, 4  ;;  %s45_s18 = sshll.u32 %s1472_s17, 4  ;;  %s23_s16 = int_to_ptr.vmem [resolvable:$true] %s22_s16  ;;  %s46_s18 = int_to_ptr.vmem [resolvable:$true] %s45_s18 }
  0x16   :  { %s1372_s21 = scalar_lea.hbm %s1613_s0, 1024 }
  0x17   :  { %p1373_p8 = scmp.ne.s32.totalorder %s1613_s0, %s1372_s21  ;;  %p1376_p9 = scmp.lt.u32.totalorder %s1372_s21, %s1613_s0 }
  0x19   :  { %p1378_p10 = pnand %p1376_p9, %p1373_p8 }
  0x1b   :  { %1381 = shalt.err (!%p1378_p10)
}
  0x1c   :  { %s1382_s1 = scalar_lea.vmem %s23_s16, 1024  ;;  %p1387_p12 = scmp.lt.s32.totalorder %s23_s16, %s23_s16 }
  0x1d   :  { %p1383_p11 = scmp.ne.s32.totalorder %s23_s16, %s1382_s1  ;;  %p1388_p13 = scmp.lt.s32.totalorder %s1382_s1, %s1382_s1 }
  0x1f   :  { %p1389_p0 = por %p1388_p13, %p1387_p12 }
  0x21   :  { %p1390_p1 = pnand %p1389_p0, %p1383_p11 }
  0x23   :  { %1393 = shalt.err (!%p1390_p1)
}
  0x24   :  { %25 = dma.hbm_to_vmem [thread:$0]  %s1613_s0, 1024, %s23_s16, [#allocation3]  }
  0x25   :  { %s1394_s30 = scalar_lea.hbm %s1616_s3, 1024 }
  0x26   :  { %p1395_p2 = scmp.ne.s32.totalorder %s1616_s3, %s1394_s30  ;;  %p1398_p3 = scmp.lt.u32.totalorder %s1394_s30, %s1616_s3 }
  0x28   :  { %p1400_p4 = pnand %p1398_p3, %p1395_p2 }
  0x2a   :  { %1403 = shalt.err (!%p1400_p4)
}
  0x2b   :  { %s1404_s14 = scalar_lea.vmem %s46_s18, 1024  ;;  %p1409_p6 = scmp.lt.s32.totalorder %s46_s18, %s46_s18 }
  0x2c   :  { %p1405_p5 = scmp.ne.s32.totalorder %s46_s18, %s1404_s14  ;;  %p1410_p7 = scmp.lt.s32.totalorder %s1404_s14, %s1404_s14 }
  0x2e   :  { %p1411_p8 = por %p1410_p7, %p1409_p6 }
  0x30   :  { %p1412_p9 = pnand %p1411_p8, %p1405_p5 }
  0x32   :  { %1415 = shalt.err (!%p1412_p9)
}
  0x33   :  { %51 = dma.hbm_to_vmem [thread:$0]  %s1616_s3, 1024, %s46_s18, [#allocation6], %s1469_s11, %s1469_s11, %s1470_s12  }
  0x34   :  { %s1473_s16 = smov [#allocation8]   ;;  %s1416_s21 = scalar_lea.hbm %s1618_s5, 1024 }
  0x35   :  { %s59_s17 = sshll.u32 %s1473_s16, 4  ;;  %p1417_p10 = scmp.ne.s32.totalorder %s1618_s5, %s1416_s21  ;;  %s60_s17 = int_to_ptr.vmem [resolvable:$true] %s59_s17 }
  0x36   :  { %p1420_p11 = scmp.lt.u32.totalorder %s1416_s21, %s1618_s5 }
  0x38   :  { %p1422_p12 = pnand %p1420_p11, %p1417_p10 }
  0x3a   :  { %1425 = shalt.err (!%p1422_p12)
}
  0x3b   :  { %s1426_s1 = scalar_lea.vmem %s60_s17, 1024  ;;  %p1431_p0 = scmp.lt.s32.totalorder %s60_s17, %s60_s17 }
  0x3c   :  { %p1427_p13 = scmp.ne.s32.totalorder %s60_s17, %s1426_s1  ;;  %p1432_p1 = scmp.lt.s32.totalorder %s1426_s1, %s1426_s1 }
  0x3e   :  { %p1433_p2 = por %p1432_p1, %p1431_p0 }
  0x40   :  { %p1434_p3 = pnand %p1433_p2, %p1427_p13 }
  0x42   :  { %1437 = shalt.err (!%p1434_p3)
}
  0x43   :  { %65 = dma.hbm_to_vmem [thread:$0]  %s1618_s5, 1024, %s60_s17, [#allocation9], %s1469_s11, %s1469_s11, %s1470_s12  }
  0x44   :  { %1460 = dma.done.wait [#allocation3], 1024  }
  0x45   :  { %1461 = vsyncadd [#allocation3], 4294966272 }
  0x46   :  { %1462 = dma.done.wait [#allocation6], 9216  }
  0x47   :  { %1463 = vsyncadd [#allocation6], 4294958080 }
  0x48   :  { %1464 = dma.done.wait [#allocation9], 1024  }
  0x49   :  { %1465 = vsyncadd [#allocation9], 4294966272  ;;  %v1266_v0 = vld [vmem:[#allocation5 + $0x40] sm:$0xff]   ;;  %v1270_v4 = vld [vmem:[#allocation5 + $0x48] sm:$0xff]   ;;  %vm1475_vm0 = vmmov 0  }
  0x4a   :  { %v1267_v1 = vld [vmem:[#allocation5 + $0xc0] sm:$0xff]   ;;  %1111 = vmatprep.subr.bf16.mxu0 %v1266_v0  ;;  %v1271_v5 = vld [vmem:[#allocation5 + $0xc8] sm:$0xff]   ;;  %v1274_v8 = vld [vmem:[#allocation5 + $0x50] sm:$0xff]  }
  0x4b   :  { %v1268_v2 = vld [vmem:[#allocation5] sm:$0xff]   ;;  %1133 = vmatprep.subr.bf16.mxu1 %v1267_v1  ;;  %v1272_v6 = vld [vmem:[#allocation5 + $0x8] sm:$0xff]   ;;  %v1275_v9 = vld [vmem:[#allocation5 + $0xd0] sm:$0xff]  }
  0x4c   :  { %v1269_v3 = vld [vmem:[#allocation5 + $0x80] sm:$0xff]   ;;  %1112 = vmatpush3.bf16.msra.mxu0 %v1268_v2  ;;  %v1273_v7 = vld [vmem:[#allocation5 + $0x88] sm:$0xff]   ;;  %v1276_v10 = vld [vmem:[#allocation5 + $0x10] sm:$0xff]  }
  0x4d   :  { %1134 = vmatpush3.bf16.msra.mxu1 %v1269_v3  ;;  %1113 = vmatprep.subr.bf16.mxu0 %v1270_v4  ;;  %v1277_v11 = vld [vmem:[#allocation5 + $0x90] sm:$0xff]   ;;  %v1278_v12 = vld [vmem:[#allocation5 + $0x58] sm:$0xff]   ;;  %v1282_v16 = vld [vmem:[#allocation5 + $0x60] sm:$0xff]  }
  0x4e   :  { %1135 = vmatprep.subr.bf16.mxu1 %v1271_v5  ;;  %v1279_v13 = vld [vmem:[#allocation5 + $0xd8] sm:$0xff]   ;;  %v1283_v17 = vld [vmem:[#allocation5 + $0xe0] sm:$0xff]   ;;  %v1286_v20 = vld [vmem:[#allocation5 + $0x68] sm:$0xff]  }
  0x4f   :  { %v1280_v14 = vld [vmem:[#allocation5 + $0x18] sm:$0xff]   ;;  %v1284_v18 = vld [vmem:[#allocation5 + $0x20] sm:$0xff]   ;;  %v1287_v21 = vld [vmem:[#allocation5 + $0xe8] sm:$0xff]  }
  0x50   :  { %1114 = vmatpush3.bf16.msra.mxu0 %v1272_v6  ;;  %v1281_v15 = vld [vmem:[#allocation5 + $0x98] sm:$0xff]   ;;  %v1285_v19 = vld [vmem:[#allocation5 + $0xa0] sm:$0xff]   ;;  %v1288_v22 = vld [vmem:[#allocation5 + $0x28] sm:$0xff]  }
  0x51   :  { %1136 = vmatpush3.bf16.msra.mxu1 %v1273_v7  ;;  %1115 = vmatprep.subr.bf16.mxu0 %v1274_v8  ;;  %v1289_v23 = vld [vmem:[#allocation5 + $0xa8] sm:$0xff]   ;;  %v1290_v24 = vld [vmem:[#allocation5 + $0x70] sm:$0xff]   ;;  %v1294_v28 = vld [vmem:[#allocation5 + $0x78] sm:$0xff]  }
  0x52   :  { %1137 = vmatprep.subr.bf16.mxu1 %v1275_v9  ;;  %v1291_v25 = vld [vmem:[#allocation5 + $0xf0] sm:$0xff]   ;;  %v1295_v29 = vld [vmem:[#allocation5 + $0xf8] sm:$0xff]   ;;  %v82_v32 = vld [vmem:[#allocation2 + $0x8] sm:$0xff] }
  0x53   :  { %v1292_v26 = vld [vmem:[#allocation5 + $0x30] sm:$0xff]   ;;  %v1296_v30 = vld [vmem:[#allocation5 + $0x38] sm:$0xff]   ;;  %v81_v34 = vld [vmem:[#allocation2] sm:$0xff]  ;;  %v90_v35 = vpack.c.bf16 %v82_v32, %v82_v32 }
  0x54   :  { %1116 = vmatpush3.bf16.msra.mxu0 %v1276_v10  ;;  %v1293_v27 = vld [vmem:[#allocation5 + $0xb0] sm:$0xff]   ;;  %v1297_v31 = vld [vmem:[#allocation5 + $0xb8] sm:$0xff]   ;;  %v89_v37 = vpack.c.bf16 %v81_v34, %v81_v34  ;;  %v1298_v40 = vld [vmem:[#allocation5 + $0x140] sm:$0xff]  }
  0x55   :  { %1138 = vmatpush3.bf16.msra.mxu1 %v1277_v11  ;;  %1117 = vmatprep.subr.bf16.mxu0 %v1278_v12  ;;  %v84_v33 = vld [vmem:[#allocation2 + $0x18] sm:$0xff]  ;;  %v83_v38 = vld [vmem:[#allocation2 + $0x10] sm:$0xff]  ;;  %v1299_v41 = vld [vmem:[#allocation5 + $0x1c0] sm:$0xff]  }
  0x56   :  { %1139 = vmatprep.subr.bf16.mxu1 %v1279_v13  ;;  %v92_v36 = vpack.c.bf16 %v84_v33, %v84_v33  ;;  %v91_v39 = vpack.c.bf16 %v83_v38, %v83_v38  ;;  %648 = vmatprep.mubr.bf16.mxu0 %v90_v35  ;;  %v1300_v42 = vld [vmem:[#allocation5 + $0x100] sm:$0xff]   ;;  %v1302_v44 = vld [vmem:[#allocation5 + $0x148] sm:$0xff]   ;;  %v1306_v48 = vld [vmem:[#allocation5 + $0x150] sm:$0xff]  }
  0x57   :  { %v1301_v43 = vld [vmem:[#allocation5 + $0x180] sm:$0xff]   ;;  %v1303_v45 = vld [vmem:[#allocation5 + $0x1c8] sm:$0xff]   ;;  %v1307_v49 = vld [vmem:[#allocation5 + $0x1d0] sm:$0xff]  }
  0x58   :  { %1118 = vmatpush3.bf16.msra.mxu0 %v1280_v14  ;;  %688 = vmatprep.mubr.bf16.mxu1 %v92_v36  ;;  %v1304_v46 = vld [vmem:[#allocation5 + $0x108] sm:$0xff]   ;;  %v1308_v50 = vld [vmem:[#allocation5 + $0x110] sm:$0xff]   ;;  %v1310_v52 = vld [vmem:[#allocation5 + $0x158] sm:$0xff]  }
  0x59   :  { %1140 = vmatpush3.bf16.msra.mxu1 %v1281_v15  ;;  %1119 = vmatprep.subr.bf16.mxu0 %v1282_v16  ;;  %v1305_v47 = vld [vmem:[#allocation5 + $0x188] sm:$0xff]   ;;  %v1309_v51 = vld [vmem:[#allocation5 + $0x190] sm:$0xff]   ;;  %v1311_v53 = vld [vmem:[#allocation5 + $0x1d8] sm:$0xff]  }
  0x5a   :  { %1141 = vmatprep.subr.bf16.mxu1 %v1283_v17  ;;  %v1312_v54 = vld [vmem:[#allocation5 + $0x118] sm:$0xff]   ;;  %v1314_v56 = vld [vmem:[#allocation5 + $0x160] sm:$0xff]   ;;  %v1318_v60 = vld [vmem:[#allocation5 + $0x168] sm:$0xff]   ;;  %v1474_v17 = vmov 0.0  }
  0x5b   :  { %v1313_v55 = vld [vmem:[#allocation5 + $0x198] sm:$0xff]   ;;  %v1315_v57 = vld [vmem:[#allocation5 + $0x1e0] sm:$0xff]   ;;  %v1319_v61 = vld [vmem:[#allocation5 + $0x1e8] sm:$0xff]  }
  0x5c   :  { %1120 = vmatpush3.bf16.msra.mxu0 %v1284_v18  ;;  %v1316_v58 = vld [vmem:[#allocation5 + $0x120] sm:$0xff]   ;;  %v1320_v62 = vld [vmem:[#allocation5 + $0x128] sm:$0xff]   ;;  %v1322_v0 = vld [vmem:[#allocation5 + $0x170] sm:$0xff]  }
  0x5d   :  { %1142 = vmatpush3.bf16.msra.mxu1 %v1285_v19  ;;  %1121 = vmatprep.subr.bf16.mxu0 %v1286_v20  ;;  %v1317_v59 = vld [vmem:[#allocation5 + $0x1a0] sm:$0xff]   ;;  %v1321_v63 = vld [vmem:[#allocation5 + $0x1a8] sm:$0xff]   ;;  %v1323_v1 = vld [vmem:[#allocation5 + $0x1f0] sm:$0xff]  }
  0x5e   :  { %1143 = vmatprep.subr.bf16.mxu1 %v1287_v21  ;;  %v1324_v2 = vld [vmem:[#allocation5 + $0x130] sm:$0xff]   ;;  %v1326_v4 = vld [vmem:[#allocation5 + $0x178] sm:$0xff]   ;;  %v86_v8 = vld [vmem:[#allocation2 + $0x28] sm:$0xff] }
  0x5f   :  { %v1325_v3 = vld [vmem:[#allocation5 + $0x1b0] sm:$0xff]   ;;  %v1327_v5 = vld [vmem:[#allocation5 + $0x1f8] sm:$0xff]   ;;  %v94_v10 = vpack.c.bf16 %v86_v8, %v86_v8  ;;  %v85_v12 = vld [vmem:[#allocation2 + $0x20] sm:$0xff] }
  0x60   :  { %1122 = vmatpush3.bf16.msra.mxu0 %v1288_v22  ;;  %v1328_v6 = vld [vmem:[#allocation5 + $0x138] sm:$0xff]   ;;  %v87_v13 = vld [vmem:[#allocation2 + $0x30] sm:$0xff]  ;;  %v93_v14 = vpack.c.bf16 %v85_v12, %v85_v12  ;;  %v1330_v16 = vld [vmem:[#allocation7] sm:$0xff]  }
  0x61   :  { %1144 = vmatpush3.bf16.msra.mxu1 %v1289_v23  ;;  %1123 = vmatprep.subr.bf16.mxu0 %v1290_v24  ;;  %v1329_v7 = vld [vmem:[#allocation5 + $0x1b8] sm:$0xff]   ;;  %v95_v15 = vpack.c.bf16 %v87_v13, %v87_v13  ;;  %v1331_v18 = vld [vmem:[#allocation7 + $0x8] sm:$0xff]   ;;  %v1332_v19 = vld [vmem:[#allocation7 + $0x10] sm:$0xff]  }
  0x62   :  { %1145 = vmatprep.subr.bf16.mxu1 %v1291_v25  ;;  %v88_v9 = vld [vmem:[#allocation2 + $0x38] sm:$0xff]  ;;  %v1334_v21 = vld [vmem:[#allocation7 + $0x20] sm:$0xff]   ;;  %v1335_v22 = vld [vmem:[#allocation7 + $0x28] sm:$0xff]  }
  0x63   :  { %v96_v11 = vpack.c.bf16 %v88_v9, %v88_v9  ;;  %v1333_v20 = vld [vmem:[#allocation7 + $0x18] sm:$0xff]   ;;  %v1336_v23 = vld [vmem:[#allocation7 + $0x30] sm:$0xff]   ;;  %v1338_v25 = vld [vmem:[#allocation8] sm:$0xff]  }
  0x64   :  { %1124 = vmatpush3.bf16.msra.mxu0 %v1292_v26  ;;  %v1337_v24 = vld [vmem:[#allocation7 + $0x38] sm:$0xff]   ;;  %v1339_v26 = vld [vmem:[#allocation8 + $0x8] sm:$0xff]   ;;  %v1027_v33 = vld [vmem:[%s1615_s2] ss:$0 sm:$0xff] }
  0x65   :  { %1146 = vmatpush3.bf16.msra.mxu1 %v1293_v27  ;;  %1125 = vmatprep.subr.bf16.mxu0 %v1294_v28  ;;  %v1340_v27 = vld [vmem:[#allocation8 + $0x10] sm:$0xff]   ;;  %v1341_v28 = vld [vmem:[#allocation8 + $0x18] sm:$0xff]  }
  0x66   :  { %1147 = vmatprep.subr.bf16.mxu1 %v1295_v29  ;;  %v1342_v29 = vld [vmem:[#allocation8 + $0x20] sm:$0xff]  }
  0x68   :  { %1126 = vmatpush3.bf16.msra.mxu0 %v1296_v30  ;;  %v1343_v30 = vld [vmem:[#allocation8 + $0x28] sm:$0xff]  }
  0x69   :  { %1148 = vmatpush3.bf16.msra.mxu1 %v1297_v31  ;;  %1155 = vmatprep.subr.bf16.mxu0 %v1298_v40 }
  0x6a   :  { %1177 = vmatprep.subr.bf16.mxu1 %v1299_v41 }
  0x6b   :  { %649 = vmatmul.mubr.bf16.vlgmr.msra.gmra.mrb[0].mxu0 %v89_v37 }
  0x6c   :  { %689 = vmatmul.mubr.bf16.vlgmr.msra.gmra.mrb[0].mxu1 %v91_v39  ;;  %1156 = vmatpush3.bf16.msra.mxu0 %v1300_v42 }
  0x6d   :  { %1178 = vmatpush3.bf16.msra.mxu1 %v1301_v43  ;;  %1157 = vmatprep.subr.bf16.mxu0 %v1302_v44 }
  0x6e   :  { %1179 = vmatprep.subr.bf16.mxu1 %v1303_v45  ;;  %728 = vmatprep.mubr.bf16.mxu0 %v94_v10 }
  0x6f   :  { %768 = vmatprep.mubr.bf16.mxu1 %v96_v11 }
  0x70   :  { %1158 = vmatpush3.bf16.msra.mxu0 %v1304_v46 }
  0x71   :  { %1180 = vmatpush3.bf16.msra.mxu1 %v1305_v47  ;;  %1159 = vmatprep.subr.bf16.mxu0 %v1306_v48 }
  0x72   :  { %1181 = vmatprep.subr.bf16.mxu1 %v1307_v49 }
  0x74   :  { %1160 = vmatpush3.bf16.msra.mxu0 %v1308_v50 }
  0x75   :  { %1182 = vmatpush3.bf16.msra.mxu1 %v1309_v51  ;;  %1161 = vmatprep.subr.bf16.mxu0 %v1310_v52 }
  0x76   :  { %1183 = vmatprep.subr.bf16.mxu1 %v1311_v53 }
  0x78   :  { %1162 = vmatpush3.bf16.msra.mxu0 %v1312_v54 }
  0x79   :  { %1184 = vmatpush3.bf16.msra.mxu1 %v1313_v55  ;;  %1163 = vmatprep.subr.bf16.mxu0 %v1314_v56 }
  0x7a   :  { %1185 = vmatprep.subr.bf16.mxu1 %v1315_v57 }
  0x7c   :  { %1164 = vmatpush3.bf16.msra.mxu0 %v1316_v58  ;;  %v1344_v58 = vld [vmem:[#allocation8 + $0x30] sm:$0xff]  }
  0x7d   :  { %1186 = vmatpush3.bf16.msra.mxu1 %v1317_v59  ;;  %1165 = vmatprep.subr.bf16.mxu0 %v1318_v60  ;;  %v1345_v59 = vld [vmem:[#allocation8 + $0x38] sm:$0xff]   ;;  %v1092_v60 = vld [vmem:[%s1617_s4] ss:$0 sm:$0xff]  ;;  %s1476_s4 = smov [#allocation10]  }
  0x7e   :  { %1187 = vmatprep.subr.bf16.mxu1 %v1319_v61  ;;  %s1016_s28 = sshll.u32 %s1476_s4, 4  ;;  %s1017_s28 = int_to_ptr.vmem [resolvable:$true] %s1016_s28 }
  0x7f   :  { %s1438_s29 = scalar_lea.vmem %s1017_s28, 64  ;;  %p1443_p5 = scmp.lt.s32.totalorder %s1017_s28, %s1017_s28 }
  0x80   :  { %1166 = vmatpush3.bf16.msra.mxu0 %v1320_v62  ;;  %p1439_p4 = scmp.ne.s32.totalorder %s1017_s28, %s1438_s29  ;;  %p1444_p6 = scmp.lt.s32.totalorder %s1438_s29, %s1438_s29 }
  0x81   :  { %1188 = vmatpush3.bf16.msra.mxu1 %v1321_v63  ;;  %1167 = vmatprep.subr.bf16.mxu0 %v1322_v0 }
  0x82   :  { %1189 = vmatprep.subr.bf16.mxu1 %v1323_v1  ;;  %p1445_p7 = por %p1444_p6, %p1443_p5 }
  0x84   :  { %1168 = vmatpush3.bf16.msra.mxu0 %v1324_v2  ;;  %p1446_p8 = pnand %p1445_p7, %p1439_p4 }
  0x85   :  { %1190 = vmatpush3.bf16.msra.mxu1 %v1325_v3  ;;  %1169 = vmatprep.subr.bf16.mxu0 %v1326_v4  ;;  %v1101_v4 = vld [vmem:[%s1619_s6] ss:$0 sm:$0xff] }
  0x86   :  { %1191 = vmatprep.subr.bf16.mxu1 %v1327_v5 }
  0x88   :  { %1170 = vmatpush3.bf16.msra.mxu0 %v1328_v6 }
  0x89   :  { %1192 = vmatpush3.bf16.msra.mxu1 %v1329_v7  ;;  %1217 = vmatprep.subr.bf16.mxu0 %v1474_v17 }
  0x8a   :  { %1237 = vmatprep.subr.bf16.mxu1 %v1474_v17 }
  0x8b   :  { %729 = vmatmul.mubr.bf16.vlgmr.msra.gmra.mrb[4].mxu0 %v93_v14 }
  0x8c   :  { %769 = vmatmul.mubr.bf16.vlgmr.msra.gmra.mrb[4].mxu1 %v95_v15  ;;  %1218 = vmatpush3.bf16.msra.mxu0 %v1330_v16 }
  0x8d   :  { %1219 = vmatprep.subr.bf16.mxu0 %v1474_v17  ;;  %1233 = vmatprep.mubr.msk.bf16.mxu0 %vm1475_vm0, %v1474_v17 }
  0x8e   :  { %1253 = vmatprep.mubr.msk.bf16.mxu1 %vm1475_vm0, %v1474_v17  ;;  %1238 = vmatpush3.bf16.msra.mxu1 %v1338_v25 }
  0x8f   :  { %1239 = vmatprep.subr.bf16.mxu1 %v1474_v17 }
  0x90   :  { %1220 = vmatpush3.bf16.msra.mxu0 %v1331_v18 }
  0x91   :  { %1221 = vmatprep.subr.bf16.mxu0 %v1474_v17 }
  0x92   :  { %1240 = vmatpush3.bf16.msra.mxu1 %v1339_v26 }
  0x93   :  { %1241 = vmatprep.subr.bf16.mxu1 %v1474_v17 }
  0x94   :  { %1222 = vmatpush3.bf16.msra.mxu0 %v1332_v19 }
  0x95   :  { %1223 = vmatprep.subr.bf16.mxu0 %v1474_v17 }
  0x96   :  { %1242 = vmatpush3.bf16.msra.mxu1 %v1340_v27 }
  0x97   :  { %1243 = vmatprep.subr.bf16.mxu1 %v1474_v17 }
  0x98   :  { %1224 = vmatpush3.bf16.msra.mxu0 %v1333_v20 }
  0x99   :  { %1225 = vmatprep.subr.bf16.mxu0 %v1474_v17 }
  0x9a   :  { %1244 = vmatpush3.bf16.msra.mxu1 %v1341_v28 }
  0x9b   :  { %1245 = vmatprep.subr.bf16.mxu1 %v1474_v17 }
  0x9c   :  { %1226 = vmatpush3.bf16.msra.mxu0 %v1334_v21 }
  0x9d   :  { %1227 = vmatprep.subr.bf16.mxu0 %v1474_v17 }
  0x9e   :  { %1246 = vmatpush3.bf16.msra.mxu1 %v1342_v29 }
  0x9f   :  { %1247 = vmatprep.subr.bf16.mxu1 %v1474_v17 }
  0xa0   :  { %1228 = vmatpush3.bf16.msra.mxu0 %v1335_v22 }
  0xa1   :  { %1229 = vmatprep.subr.bf16.mxu0 %v1474_v17 }
  0xa2   :  { %1248 = vmatpush3.bf16.msra.mxu1 %v1343_v30 }
  0xa3   :  { %1249 = vmatprep.subr.bf16.mxu1 %v1474_v17 }
  0xa4   :  { %1230 = vmatpush3.bf16.msra.mxu0 %v1336_v23 }
  0xa5   :  { %1231 = vmatprep.subr.bf16.mxu0 %v1474_v17 }
  0xa6   :  { %1250 = vmatpush3.bf16.msra.mxu1 %v1344_v58 }
  0xa7   :  { %1251 = vmatprep.subr.bf16.mxu1 %v1474_v17 }
  0xa8   :  { %1232 = vmatpush3.bf16.msra.mxu0 %v1337_v24 }
  0xaa   :  { %1252 = vmatpush3.bf16.msra.mxu1 %v1345_v59 }
 0x13e   :  { %v1127_v31 = vpop.f32.mrb[0].mxu0 }
 0x13f   :  { %v1149_v32 = vpop.f32.mrb[0].mxu1  ;;  %v1128_v34 = vpop.f32.mrb[1].mxu0 }
 0x140   :  { %v1150_v35 = vpop.f32.mrb[1].mxu1  ;;  %v1129_v36 = vadd.f32 %v1128_v34, %v1127_v31  ;;  %v1130_v38 = vpop.f32.mrb[2].mxu0 }
 0x141   :  { %v1151_v37 = vadd.f32 %v1150_v35, %v1149_v32  ;;  %v1152_v39 = vpop.f32.mrb[2].mxu1  ;;  %v1131_v40 = vpop.f32.mrb[3].mxu0 }
 0x142   :  { %v1153_v41 = vpop.f32.mrb[3].mxu1  ;;  %v651_v42 = vadd.f32 %v1129_v36, %v1027_v33 }
 0x144   :  { %v691_v43 = vadd.f32 %v1151_v37, %v651_v42 }
 0x15e   :  { %v1171_v44 = vpop.f32.mrb[4].mxu0 }
 0x15f   :  { %v1193_v45 = vpop.f32.mrb[4].mxu1  ;;  %v1172_v46 = vpop.f32.mrb[5].mxu0 }
 0x160   :  { %v1173_v47 = vadd.f32 %v1172_v46, %v1171_v44  ;;  %v1194_v48 = vpop.f32.mrb[5].mxu1  ;;  %v1174_v49 = vpop.f32.mrb[6].mxu0 }
 0x161   :  { %v1195_v50 = vadd.f32 %v1194_v48, %v1193_v45  ;;  %v1196_v51 = vpop.f32.mrb[6].mxu1  ;;  %v1175_v52 = vpop.f32.mrb[7].mxu0 }
 0x162   :  { %v731_v53 = vadd.f32 %v1173_v47, %v691_v43  ;;  %v1197_v54 = vpop.f32.mrb[7].mxu1 }
 0x164   :  { %v771_v55 = vadd.f32 %v1195_v50, %v731_v53 }
 0x166   :  { %v776_v56 = vmax.f32 %v771_v55, 0.0 }
 0x168   :  { %v777_v57 = vpack.c.bf16 %v776_v56, %v776_v56 }
 0x16a   :  { %1234 = vmatmul.mubr.bf16.vlgmr.msra.gmra.mrb[8].mxu0 %v777_v57 }
 0x23d   :  { %v883_v61 = vpop.f32.mrb[8].mxu0 }
 0x23e   :  { %v884_v62 = vadd.f32 %v1092_v60, %v883_v61  ;;  %v1235_v63 = vpop.f32.mrb[9].mxu0 }
 0x23f   :  { %v886_v0 = vpop.f32.mrb[10].mxu0 }
 0x240   :  { %v889_v1 = vmax.f32 %v884_v62, 0.0  ;;  %v1236_v2 = vpop.f32.mrb[11].mxu0 }
 0x242   :  { %v890_v3 = vpack.c.bf16 %v889_v1, %v889_v1 }
 0x244   :  { %1254 = vmatmul.mubr.bf16.vlgmr.msra.gmra.mrb[8].mxu1 %v890_v3 }
 0x317   :  { %v996_v5 = vpop.f32.mrb[8].mxu1 }
 0x318   :  { %v997_v6 = vadd.f32 %v1101_v4, %v996_v5  ;;  %v1255_v7 = vpop.f32.mrb[9].mxu1 }
 0x319   :  { %v999_v8 = vpop.f32.mrb[10].mxu1 }
 0x31a   :  { %v1110_v9 = vmul.f32 -1.442695, %v997_v6  ;;  %v1256_v10 = vpop.f32.mrb[11].mxu1 }
 0x31c   :  { %1346 = vpow2.f32 %v1110_v9 }
 0x326   :  { %v1347_v11 = vpop.eup %1346 }
 0x327   :  { %v1005_v12 = vadd.f32 1.0, %v1347_v11 }
 0x329   :  { %1348 = vrcp.f32 %v1005_v12 }
 0x333   :  { %v1349_v13 = vpop.eup %1348 }
 0x334   :  { %v1008_v14 = vpack.c.bf16 %v1349_v13, %v1349_v13 }
 0x336   :  { %1009 = vst [vmem:[#allocation10] sm:$0xf] %v1008_v14 }
 0x337   :  { %1449 = shalt.err (!%p1446_p8)
}
 0x338   :  { %s1450_s8 = scalar_lea.hbm %s1620_s7, 64 }
 0x339   :  { %p1451_p9 = scmp.ne.s32.totalorder %s1620_s7, %s1450_s8  ;;  %p1454_p10 = scmp.lt.u32.totalorder %s1450_s8, %s1620_s7 }
 0x33b   :  { %p1456_p11 = pnand %p1454_p10, %p1451_p9 }
 0x33d   :  { %1459 = shalt.err (!%p1456_p11)
}
 0x33e   :  { %1019 = dma.vmem_to_hbm [thread:$0]  %s1017_s28, 64, %s1620_s7, [#allocation4]  }
 0x33f   :  { %1466 = dma.done.wait [#allocation4], 64  }
 0x340   :  { %1467 = vsyncadd [#allocation4], 4294967232 }
 0x341   :  { %1023 = vsyncpa [#allocation3], 1 }
 0x342   :  { %1024 = vsyncpa [#allocation6], 1 }
 0x343   :  { %1025 = vsyncpa [#allocation9], 1 }
 0x344   :  { %1026 = vsyncpa [#allocation4], 1 }

// kernel: tpu_custom_call.1
= control target key start
LH: loop header
LB: loop body
LE: loop exit
PB: predicated region body
PF: predicated region fallthrough
CT: control target
= control target key end

     0   :  { %12 = vsyncpa [#allocation3], 0  ;;  %s1613_s0 = inlined_call_operand.hbm [shape: f32[8,1024], index: 0, kind: input, shape index: {}]   ;;  %s1614_s1 = inlined_call_operand.hbm [shape: bf16[1024,128], index: 1, kind: input, shape index: {}]   ;;  %s1615_s2 = inlined_call_operand.vmem [shape: f32[1,128], index: 2, kind: input, shape index: {}]   ;;  %s1616_s3 = inlined_call_operand.hbm [shape: bf16[128,128], index: 3, kind: input, shape index: {}]   ;;  %s1617_s4 = inlined_call_operand.vmem [shape: f32[1,128], index: 4, kind: input, shape index: {}]   ;;  %s1618_s5 = inlined_call_operand.hbm [shape: bf16[128,128], index: 5, kind: input, shape index: {}]   ;;  %s1619_s6 = inlined_call_operand.vmem [shape: f32[1,128], index: 6, kind: input, shape index: {}]   ;;  %s1620_s7 = inlined_call_operand.hbm [shape: bf16[8,128], index: 7, kind: output, shape index: {}]  }
   0x1   :  { %13 = vsyncpa [#allocation6], 0 }
   0x2   :  { %14 = vsyncpa [#allocation9], 0 }
   0x3   :  { %15 = vsyncpa [#allocation4], 0  ;;  %s1468_s24 = smov [#allocation5]   ;;  %s1350_s28 = scalar_lea.hbm %s1614_s1, 8192 }
   0x4   :  { %s31_s25 = sshll.u32 %s1468_s24, 4  ;;  %p1351_p0 = scmp.ne.s32.totalorder %s1614_s1, %s1350_s28  ;;  %s32_s25 = int_to_ptr.vmem [resolvable:$true] %s31_s25 }
   0x5   :  { %p1354_p1 = scmp.lt.u32.totalorder %s1350_s28, %s1614_s1 }
   0x7   :  { %p1356_p2 = pnand %p1354_p1, %p1351_p0 }
   0x9   :  { %1359 = shalt.err (!%p1356_p2)
}
   0xa   :  { %s1360_s10 = scalar_lea.vmem %s32_s25, 8192  ;;  %p1365_p4 = scmp.lt.s32.totalorder %s32_s25, %s32_s25 }
   0xb   :  { %p1361_p3 = scmp.ne.s32.totalorder %s32_s25, %s1360_s10  ;;  %p1366_p5 = scmp.lt.s32.totalorder %s1360_s10, %s1360_s10 }
   0xd   :  { %p1367_p6 = por %p1366_p5, %p1365_p4 }
   0xf   :  { %p1368_p7 = pnand %p1367_p6, %p1361_p3 }
  0x11   :  { %1371 = shalt.err (!%p1368_p7)
}
  0x12   :  { %s1469_s11 = smov 64   ;;  %s1470_s12 = smov 4  }
  0x13   :  { %37 = dma.hbm_to_vmem [thread:$0]  %s1614_s1, 8192, %s32_s25, [#allocation6], %s1469_s11, %s1469_s11, %s1470_s12  }
  0x14   :  { %s1471_s15 = smov [#allocation2]   ;;  %s1472_s17 = smov [#allocation7]  }
  0x15   :  { %s22_s16 = sshll.u32 %s1471_s15, 4  ;;  %s45_s18 = sshll.u32 %s1472_s17, 4  ;;  %s23_s16 = int_to_ptr.vmem [resolvable:$true] %s22_s16  ;;  %s46_s18 = int_to_ptr.vmem [resolvable:$true] %s45_s18 }
  0x16   :  { %s1372_s21 = scalar_lea.hbm %s1613_s0, 1024 }
  0x17   :  { %p1373_p8 = scmp.ne.s32.totalorder %s1613_s0, %s1372_s21  ;;  %p1376_p9 = scmp.lt.u32.totalorder %s1372_s21, %s1613_s0 }
  0x19   :  { %p1378_p10 = pnand %p1376_p9, %p1373_p8 }
  0x1b   :  { %1381 = shalt.err (!%p1378_p10)
}
  0x1c   :  { %s1382_s1 = scalar_lea.vmem %s23_s16, 1024  ;;  %p1387_p12 = scmp.lt.s32.totalorder %s23_s16, %s23_s16 }
  0x1d   :  { %p1383_p11 = scmp.ne.s32.totalorder %s23_s16, %s1382_s1  ;;  %p1388_p13 = scmp.lt.s32.totalorder %s1382_s1, %s1382_s1 }
  0x1f   :  { %p1389_p0 = por %p1388_p13, %p1387_p12 }
  0x21   :  { %p1390_p1 = pnand %p1389_p0, %p1383_p11 }
  0x23   :  { %1393 = shalt.err (!%p1390_p1)
}
  0x24   :  { %25 = dma.hbm_to_vmem [thread:$0]  %s1613_s0, 1024, %s23_s16, [#allocation3]  }
  0x25   :  { %s1394_s30 = scalar_lea.hbm %s1616_s3, 1024 }
  0x26   :  { %p1395_p2 = scmp.ne.s32.totalorder %s1616_s3, %s1394_s30  ;;  %p1398_p3 = scmp.lt.u32.totalorder %s1394_s30, %s1616_s3 }
  0x28   :  { %p1400_p4 = pnand %p1398_p3, %p1395_p2 }
  0x2a   :  { %1403 = shalt.err (!%p1400_p4)
}
  0x2b   :  { %s1404_s14 = scalar_lea.vmem %s46_s18, 1024  ;;  %p1409_p6 = scmp.lt.s32.totalorder %s46_s18, %s46_s18 }
  0x2c   :  { %p1405_p5 = scmp.ne.s32.totalorder %s46_s18, %s1404_s14  ;;  %p1410_p7 = scmp.lt.s32.totalorder %s1404_s14, %s1404_s14 }
  0x2e   :  { %p1411_p8 = por %p1410_p7, %p1409_p6 }
  0x30   :  { %p1412_p9 = pnand %p1411_p8, %p1405_p5 }
  0x32   :  { %1415 = shalt.err (!%p1412_p9)
}
  0x33   :  { %51 = dma.hbm_to_vmem [thread:$0]  %s1616_s3, 1024, %s46_s18, [#allocation6], %s1469_s11, %s1469_s11, %s1470_s12  }
  0x34   :  { %s1473_s16 = smov [#allocation8]   ;;  %s1416_s21 = scalar_lea.hbm %s1618_s5, 1024 }
  0x35   :  { %s59_s17 = sshll.u32 %s1473_s16, 4  ;;  %p1417_p10 = scmp.ne.s32.totalorder %s1618_s5, %s1416_s21  ;;  %s60_s17 = int_to_ptr.vmem [resolvable:$true] %s59_s17 }
  0x36   :  { %p1420_p11 = scmp.lt.u32.totalorder %s1416_s21, %s1618_s5 }
  0x38   :  { %p1422_p12 = pnand %p1420_p11, %p1417_p10 }
  0x3a   :  { %1425 = shalt.err (!%p1422_p12)
}
  0x3b   :  { %s1426_s1 = scalar_lea.vmem %s60_s17, 1024  ;;  %p1431_p0 = scmp.lt.s32.totalorder %s60_s17, %s60_s17 }
  0x3c   :  { %p1427_p13 = scmp.ne.s32.totalorder %s60_s17, %s1426_s1  ;;  %p1432_p1 = scmp.lt.s32.totalorder %s1426_s1, %s1426_s1 }
  0x3e   :  { %p1433_p2 = por %p1432_p1, %p1431_p0 }
  0x40   :  { %p1434_p3 = pnand %p1433_p2, %p1427_p13 }
  0x42   :  { %1437 = shalt.err (!%p1434_p3)
}
  0x43   :  { %65 = dma.hbm_to_vmem [thread:$0]  %s1618_s5, 1024, %s60_s17, [#allocation9], %s1469_s11, %s1469_s11, %s1470_s12  }
  0x44   :  { %1460 = dma.done.wait [#allocation3], 1024  }
  0x45   :  { %1461 = vsyncadd [#allocation3], 4294966272 }
  0x46   :  { %1462 = dma.done.wait [#allocation6], 9216  }
  0x47   :  { %1463 = vsyncadd [#allocation6], 4294958080 }
  0x48   :  { %1464 = dma.done.wait [#allocation9], 1024  }
  0x49   :  { %1465 = vsyncadd [#allocation9], 4294966272  ;;  %v1266_v0 = vld [vmem:[#allocation5 + $0x40] sm:$0xff]   ;;  %v1270_v4 = vld [vmem:[#allocation5 + $0x48] sm:$0xff]   ;;  %vm1475_vm0 = vmmov 0  }
  0x4a   :  { %v1267_v1 = vld [vmem:[#allocation5 + $0xc0] sm:$0xff]   ;;  %1111 = vmatprep.subr.bf16.mxu0 %v1266_v0  ;;  %v1271_v5 = vld [vmem:[#allocation5 + $0xc8] sm:$0xff]   ;;  %v1274_v8 = vld [vmem:[#allocation5 + $0x50] sm:$0xff]  }
  0x4b   :  { %v1268_v2 = vld [vmem:[#allocation5] sm:$0xff]   ;;  %1133 = vmatprep.subr.bf16.mxu1 %v1267_v1  ;;  %v1272_v6 = vld [vmem:[#allocation5 + $0x8] sm:$0xff]   ;;  %v1275_v9 = vld [vmem:[#allocation5 + $0xd0] sm:$0xff]  }
  0x4c   :  { %v1269_v3 = vld [vmem:[#allocation5 + $0x80] sm:$0xff]   ;;  %1112 = vmatpush3.bf16.msra.mxu0 %v1268_v2  ;;  %v1273_v7 = vld [vmem:[#allocation5 + $0x88] sm:$0xff]   ;;  %v1276_v10 = vld [vmem:[#allocation5 + $0x10] sm:$0xff]  }
  0x4d   :  { %1134 = vmatpush3.bf16.msra.mxu1 %v1269_v3  ;;  %1113 = vmatprep.subr.bf16.mxu0 %v1270_v4  ;;  %v1277_v11 = vld [vmem:[#allocation5 + $0x90] sm:$0xff]   ;;  %v1278_v12 = vld [vmem:[#allocation5 + $0x58] sm:$0xff]   ;;  %v1282_v16 = vld [vmem:[#allocation5 + $0x60] sm:$0xff]  }
  0x4e   :  { %1135 = vmatprep.subr.bf16.mxu1 %v1271_v5  ;;  %v1279_v13 = vld [vmem:[#allocation5 + $0xd8] sm:$0xff]   ;;  %v1283_v17 = vld [vmem:[#allocation5 + $0xe0] sm:$0xff]   ;;  %v1286_v20 = vld [vmem:[#allocation5 + $0x68] sm:$0xff]  }
  0x4f   :  { %v1280_v14 = vld [vmem:[#allocation5 + $0x18] sm:$0xff]   ;;  %v1284_v18 = vld [vmem:[#allocation5 + $0x20] sm:$0xff]   ;;  %v1287_v21 = vld [vmem:[#allocation5 + $0xe8] sm:$0xff]  }
  0x50   :  { %1114 = vmatpush3.bf16.msra.mxu0 %v1272_v6  ;;  %v1281_v15 = vld [vmem:[#allocation5 + $0x98] sm:$0xff]   ;;  %v1285_v19 = vld [vmem:[#allocation5 + $0xa0] sm:$0xff]   ;;  %v1288_v22 = vld [vmem:[#allocation5 + $0x28] sm:$0xff]  }
  0x51   :  { %1136 = vmatpush3.bf16.msra.mxu1 %v1273_v7  ;;  %1115 = vmatprep.subr.bf16.mxu0 %v1274_v8  ;;  %v1289_v23 = vld [vmem:[#allocation5 + $0xa8] sm:$0xff]   ;;  %v1290_v24 = vld [vmem:[#allocation5 + $0x70] sm:$0xff]   ;;  %v1294_v28 = vld [vmem:[#allocation5 + $0x78] sm:$0xff]  }
  0x52   :  { %1137 = vmatprep.subr.bf16.mxu1 %v1275_v9  ;;  %v1291_v25 = vld [vmem:[#allocation5 + $0xf0] sm:$0xff]   ;;  %v1295_v29 = vld [vmem:[#allocation5 + $0xf8] sm:$0xff]   ;;  %v82_v32 = vld [vmem:[#allocation2 + $0x8] sm:$0xff] }
  0x53   :  { %v1292_v26 = vld [vmem:[#allocation5 + $0x30] sm:$0xff]   ;;  %v1296_v30 = vld [vmem:[#allocation5 + $0x38] sm:$0xff]   ;;  %v81_v34 = vld [vmem:[#allocation2] sm:$0xff]  ;;  %v90_v35 = vpack.c.bf16 %v82_v32, %v82_v32 }
  0x54   :  { %1116 = vmatpush3.bf16.msra.mxu0 %v1276_v10  ;;  %v1293_v27 = vld [vmem:[#allocation5 + $0xb0] sm:$0xff]   ;;  %v1297_v31 = vld [vmem:[#allocation5 + $0xb8] sm:$0xff]   ;;  %v89_v37 = vpack.c.bf16 %v81_v34, %v81_v34  ;;  %v1298_v40 = vld [vmem:[#allocation5 + $0x140] sm:$0xff]  }
  0x55   :  { %1138 = vmatpush3.bf16.msra.mxu1 %v1277_v11  ;;  %1117 = vmatprep.subr.bf16.mxu0 %v1278_v12  ;;  %v84_v33 = vld [vmem:[#allocation2 + $0x18] sm:$0xff]  ;;  %v83_v38 = vld [vmem:[#allocation2 + $0x10] sm:$0xff]  ;;  %v1299_v41 = vld [vmem:[#allocation5 + $0x1c0] sm:$0xff]  }
  0x56   :  { %1139 = vmatprep.subr.bf16.mxu1 %v1279_v13  ;;  %v92_v36 = vpack.c.bf16 %v84_v33, %v84_v33  ;;  %v91_v39 = vpack.c.bf16 %v83_v38, %v83_v38  ;;  %648 = vmatprep.mubr.bf16.mxu0 %v90_v35  ;;  %v1300_v42 = vld [vmem:[#allocation5 + $0x100] sm:$0xff]   ;;  %v1302_v44 = vld [vmem:[#allocation5 + $0x148] sm:$0xff]   ;;  %v1306_v48 = vld [vmem:[#allocation5 + $0x150] sm:$0xff]  }
  0x57   :  { %v1301_v43 = vld [vmem:[#allocation5 + $0x180] sm:$0xff]   ;;  %v1303_v45 = vld [vmem:[#allocation5 + $0x1c8] sm:$0xff]   ;;  %v1307_v49 = vld [vmem:[#allocation5 + $0x1d0] sm:$0xff]  }
  0x58   :  { %1118 = vmatpush3.bf16.msra.mxu0 %v1280_v14  ;;  %688 = vmatprep.mubr.bf16.mxu1 %v92_v36  ;;  %v1304_v46 = vld [vmem:[#allocation5 + $0x108] sm:$0xff]   ;;  %v1308_v50 = vld [vmem:[#allocation5 + $0x110] sm:$0xff]   ;;  %v1310_v52 = vld [vmem:[#allocation5 + $0x158] sm:$0xff]  }
  0x59   :  { %1140 = vmatpush3.bf16.msra.mxu1 %v1281_v15  ;;  %1119 = vmatprep.subr.bf16.mxu0 %v1282_v16  ;;  %v1305_v47 = vld [vmem:[#allocation5 + $0x188] sm:$0xff]   ;;  %v1309_v51 = vld [vmem:[#allocation5 + $0x190] sm:$0xff]   ;;  %v1311_v53 = vld [vmem:[#allocation5 + $0x1d8] sm:$0xff]  }
  0x5a   :  { %1141 = vmatprep.subr.bf16.mxu1 %v1283_v17  ;;  %v1312_v54 = vld [vmem:[#allocation5 + $0x118] sm:$0xff]   ;;  %v1314_v56 = vld [vmem:[#allocation5 + $0x160] sm:$0xff]   ;;  %v1318_v60 = vld [vmem:[#allocation5 + $0x168] sm:$0xff]   ;;  %v1474_v17 = vmov 0.0  }
  0x5b   :  { %v1313_v55 = vld [vmem:[#allocation5 + $0x198] sm:$0xff]   ;;  %v1315_v57 = vld [vmem:[#allocation5 + $0x1e0] sm:$0xff]   ;;  %v1319_v61 = vld [vmem:[#allocation5 + $0x1e8] sm:$0xff]  }
  0x5c   :  { %1120 = vmatpush3.bf16.msra.mxu0 %v1284_v18  ;;  %v1316_v58 = vld [vmem:[#allocation5 + $0x120] sm:$0xff]   ;;  %v1320_v62 = vld [vmem:[#allocation5 + $0x128] sm:$0xff]   ;;  %v1322_v0 = vld [vmem:[#allocation5 + $0x170] sm:$0xff]  }
  0x5d   :  { %1142 = vmatpush3.bf16.msra.mxu1 %v1285_v19  ;;  %1121 = vmatprep.subr.bf16.mxu0 %v1286_v20  ;;  %v1317_v59 = vld [vmem:[#allocation5 + $0x1a0] sm:$0xff]   ;;  %v1321_v63 = vld [vmem:[#allocation5 + $0x1a8] sm:$0xff]   ;;  %v1323_v1 = vld [vmem:[#allocation5 + $0x1f0] sm:$0xff]  }
  0x5e   :  { %1143 = vmatprep.subr.bf16.mxu1 %v1287_v21  ;;  %v1324_v2 = vld [vmem:[#allocation5 + $0x130] sm:$0xff]   ;;  %v1326_v4 = vld [vmem:[#allocation5 + $0x178] sm:$0xff]   ;;  %v86_v8 = vld [vmem:[#allocation2 + $0x28] sm:$0xff] }
  0x5f   :  { %v1325_v3 = vld [vmem:[#allocation5 + $0x1b0] sm:$0xff]   ;;  %v1327_v5 = vld [vmem:[#allocation5 + $0x1f8] sm:$0xff]   ;;  %v94_v10 = vpack.c.bf16 %v86_v8, %v86_v8  ;;  %v85_v12 = vld [vmem:[#allocation2 + $0x20] sm:$0xff] }
  0x60   :  { %1122 = vmatpush3.bf16.msra.mxu0 %v1288_v22  ;;  %v1328_v6 = vld [vmem:[#allocation5 + $0x138] sm:$0xff]   ;;  %v87_v13 = vld [vmem:[#allocation2 + $0x30] sm:$0xff]  ;;  %v93_v14 = vpack.c.bf16 %v85_v12, %v85_v12  ;;  %v1330_v16 = vld [vmem:[#allocation7] sm:$0xff]  }
  0x61   :  { %1144 = vmatpush3.bf16.msra.mxu1 %v1289_v23  ;;  %1123 = vmatprep.subr.bf16.mxu0 %v1290_v24  ;;  %v1329_v7 = vld [vmem:[#allocation5 + $0x1b8] sm:$0xff]   ;;  %v95_v15 = vpack.c.bf16 %v87_v13, %v87_v13  ;;  %v1331_v18 = vld [vmem:[#allocation7 + $0x8] sm:$0xff]   ;;  %v1332_v19 = vld [vmem:[#allocation7 + $0x10] sm:$0xff]  }
  0x62   :  { %1145 = vmatprep.subr.bf16.mxu1 %v1291_v25  ;;  %v88_v9 = vld [vmem:[#allocation2 + $0x38] sm:$0xff]  ;;  %v1334_v21 = vld [vmem:[#allocation7 + $0x20] sm:$0xff]   ;;  %v1335_v22 = vld [vmem:[#allocation7 + $0x28] sm:$0xff]  }
  0x63   :  { %v96_v11 = vpack.c.bf16 %v88_v9, %v88_v9  ;;  %v1333_v20 = vld [vmem:[#allocation7 + $0x18] sm:$0xff]   ;;  %v1336_v23 = vld [vmem:[#allocation7 + $0x30] sm:$0xff]   ;;  %v1338_v25 = vld [vmem:[#allocation8] sm:$0xff]  }
  0x64   :  { %1124 = vmatpush3.bf16.msra.mxu0 %v1292_v26  ;;  %v1337_v24 = vld [vmem:[#allocation7 + $0x38] sm:$0xff]   ;;  %v1339_v26 = vld [vmem:[#allocation8 + $0x8] sm:$0xff]   ;;  %v1027_v33 = vld [vmem:[%s1615_s2] ss:$0 sm:$0xff] }
  0x65   :  { %1146 = vmatpush3.bf16.msra.mxu1 %v1293_v27  ;;  %1125 = vmatprep.subr.bf16.mxu0 %v1294_v28  ;;  %v1340_v27 = vld [vmem:[#allocation8 + $0x10] sm:$0xff]   ;;  %v1341_v28 = vld [vmem:[#allocation8 + $0x18] sm:$0xff]  }
  0x66   :  { %1147 = vmatprep.subr.bf16.mxu1 %v1295_v29  ;;  %v1342_v29 = vld [vmem:[#allocation8 + $0x20] sm:$0xff]  }
  0x68   :  { %1126 = vmatpush3.bf16.msra.mxu0 %v1296_v30  ;;  %v1343_v30 = vld [vmem:[#allocation8 + $0x28] sm:$0xff]  }
  0x69   :  { %1148 = vmatpush3.bf16.msra.mxu1 %v1297_v31  ;;  %1155 = vmatprep.subr.bf16.mxu0 %v1298_v40 }
  0x6a   :  { %1177 = vmatprep.subr.bf16.mxu1 %v1299_v41 }
  0x6b   :  { %649 = vmatmul.mubr.bf16.vlgmr.msra.gmra.mrb[0].mxu0 %v89_v37 }
  0x6c   :  { %689 = vmatmul.mubr.bf16.vlgmr.msra.gmra.mrb[0].mxu1 %v91_v39  ;;  %1156 = vmatpush3.bf16.msra.mxu0 %v1300_v42 }
  0x6d   :  { %1178 = vmatpush3.bf16.msra.mxu1 %v1301_v43  ;;  %1157 = vmatprep.subr.bf16.mxu0 %v1302_v44 }
  0x6e   :  { %1179 = vmatprep.subr.bf16.mxu1 %v1303_v45  ;;  %728 = vmatprep.mubr.bf16.mxu0 %v94_v10 }
  0x6f   :  { %768 = vmatprep.mubr.bf16.mxu1 %v96_v11 }
  0x70   :  { %1158 = vmatpush3.bf16.msra.mxu0 %v1304_v46 }
  0x71   :  { %1180 = vmatpush3.bf16.msra.mxu1 %v1305_v47  ;;  %1159 = vmatprep.subr.bf16.mxu0 %v1306_v48 }
  0x72   :  { %1181 = vmatprep.subr.bf16.mxu1 %v1307_v49 }
  0x74   :  { %1160 = vmatpush3.bf16.msra.mxu0 %v1308_v50 }
  0x75   :  { %1182 = vmatpush3.bf16.msra.mxu1 %v1309_v51  ;;  %1161 = vmatprep.subr.bf16.mxu0 %v1310_v52 }
  0x76   :  { %1183 = vmatprep.subr.bf16.mxu1 %v1311_v53 }
  0x78   :  { %1162 = vmatpush3.bf16.msra.mxu0 %v1312_v54 }
  0x79   :  { %1184 = vmatpush3.bf16.msra.mxu1 %v1313_v55  ;;  %1163 = vmatprep.subr.bf16.mxu0 %v1314_v56 }
  0x7a   :  { %1185 = vmatprep.subr.bf16.mxu1 %v1315_v57 }
  0x7c   :  { %1164 = vmatpush3.bf16.msra.mxu0 %v1316_v58  ;;  %v1344_v58 = vld [vmem:[#allocation8 + $0x30] sm:$0xff]  }
  0x7d   :  { %1186 = vmatpush3.bf16.msra.mxu1 %v1317_v59  ;;  %1165 = vmatprep.subr.bf16.mxu0 %v1318_v60  ;;  %v1345_v59 = vld [vmem:[#allocation8 + $0x38] sm:$0xff]   ;;  %v1092_v60 = vld [vmem:[%s1617_s4] ss:$0 sm:$0xff]  ;;  %s1476_s4 = smov [#allocation10]  }
  0x7e   :  { %1187 = vmatprep.subr.bf16.mxu1 %v1319_v61  ;;  %s1016_s28 = sshll.u32 %s1476_s4, 4  ;;  %s1017_s28 = int_to_ptr.vmem [resolvable:$true] %s1016_s28 }
  0x7f   :  { %s1438_s29 = scalar_lea.vmem %s1017_s28, 64  ;;  %p1443_p5 = scmp.lt.s32.totalorder %s1017_s28, %s1017_s28 }
  0x80   :  { %1166 = vmatpush3.bf16.msra.mxu0 %v1320_v62  ;;  %p1439_p4 = scmp.ne.s32.totalorder %s1017_s28, %s1438_s29  ;;  %p1444_p6 = scmp.lt.s32.totalorder %s1438_s29, %s1438_s29 }
  0x81   :  { %1188 = vmatpush3.bf16.msra.mxu1 %v1321_v63  ;;  %1167 = vmatprep.subr.bf16.mxu0 %v1322_v0 }
  0x82   :  { %1189 = vmatprep.subr.bf16.mxu1 %v1323_v1  ;;  %p1445_p7 = por %p1444_p6, %p1443_p5 }
  0x84   :  { %1168 = vmatpush3.bf16.msra.mxu0 %v1324_v2  ;;  %p1446_p8 = pnand %p1445_p7, %p1439_p4 }
  0x85   :  { %1190 = vmatpush3.bf16.msra.mxu1 %v1325_v3  ;;  %1169 = vmatprep.subr.bf16.mxu0 %v1326_v4  ;;  %v1101_v4 = vld [vmem:[%s1619_s6] ss:$0 sm:$0xff] }
  0x86   :  { %1191 = vmatprep.subr.bf16.mxu1 %v1327_v5 }
  0x88   :  { %1170 = vmatpush3.bf16.msra.mxu0 %v1328_v6 }
  0x89   :  { %1192 = vmatpush3.bf16.msra.mxu1 %v1329_v7  ;;  %1217 = vmatprep.subr.bf16.mxu0 %v1474_v17 }
  0x8a   :  { %1237 = vmatprep.subr.bf16.mxu1 %v1474_v17 }
  0x8b   :  { %729 = vmatmul.mubr.bf16.vlgmr.msra.gmra.mrb[4].mxu0 %v93_v14 }
  0x8c   :  { %769 = vmatmul.mubr.bf16.vlgmr.msra.gmra.mrb[4].mxu1 %v95_v15  ;;  %1218 = vmatpush3.bf16.msra.mxu0 %v1330_v16 }
  0x8d   :  { %1219 = vmatprep.subr.bf16.mxu0 %v1474_v17  ;;  %1233 = vmatprep.mubr.msk.bf16.mxu0 %vm1475_vm0, %v1474_v17 }
  0x8e   :  { %1253 = vmatprep.mubr.msk.bf16.mxu1 %vm1475_vm0, %v1474_v17  ;;  %1238 = vmatpush3.bf16.msra.mxu1 %v1338_v25 }
  0x8f   :  { %1239 = vmatprep.subr.bf16.mxu1 %v1474_v17 }
  0x90   :  { %1220 = vmatpush3.bf16.msra.mxu0 %v1331_v18 }
  0x91   :  { %1221 = vmatprep.subr.bf16.mxu0 %v1474_v17 }
  0x92   :  { %1240 = vmatpush3.bf16.msra.mxu1 %v1339_v26 }
  0x93   :  { %1241 = vmatprep.subr.bf16.mxu1 %v1474_v17 }
  0x94   :  { %1222 = vmatpush3.bf16.msra.mxu0 %v1332_v19 }
  0x95   :  { %1223 = vmatprep.subr.bf16.mxu0 %v1474_v17 }
  0x96   :  { %1242 = vmatpush3.bf16.msra.mxu1 %v1340_v27 }
  0x97   :  { %1243 = vmatprep.subr.bf16.mxu1 %v1474_v17 }
  0x98   :  { %1224 = vmatpush3.bf16.msra.mxu0 %v1333_v20 }
  0x99   :  { %1225 = vmatprep.subr.bf16.mxu0 %v1474_v17 }
  0x9a   :  { %1244 = vmatpush3.bf16.msra.mxu1 %v1341_v28 }
  0x9b   :  { %1245 = vmatprep.subr.bf16.mxu1 %v1474_v17 }
  0x9c   :  { %1226 = vmatpush3.bf16.msra.mxu0 %v1334_v21 }
  0x9d   :  { %1227 = vmatprep.subr.bf16.mxu0 %v1474_v17 }
  0x9e   :  { %1246 = vmatpush3.bf16.msra.mxu1 %v1342_v29 }
  0x9f   :  { %1247 = vmatprep.subr.bf16.mxu1 %v1474_v17 }
  0xa0   :  { %1228 = vmatpush3.bf16.msra.mxu0 %v1335_v22 }
  0xa1   :  { %1229 = vmatprep.subr.bf16.mxu0 %v1474_v17 }
  0xa2   :  { %1248 = vmatpush3.bf16.msra.mxu1 %v1343_v30 }
  0xa3   :  { %1249 = vmatprep.subr.bf16.mxu1 %v1474_v17 }
  0xa4   :  { %1230 = vmatpush3.bf16.msra.mxu0 %v1336_v23 }
  0xa5   :  { %1231 = vmatprep.subr.bf16.mxu0 %v1474_v17 }
  0xa6   :  { %1250 = vmatpush3.bf16.msra.mxu1 %v1344_v58 }
  0xa7   :  { %1251 = vmatprep.subr.bf16.mxu1 %v1474_v17 }
  0xa8   :  { %1232 = vmatpush3.bf16.msra.mxu0 %v1337_v24 }
  0xaa   :  { %1252 = vmatpush3.bf16.msra.mxu1 %v1345_v59 }
 0x13e   :  { %v1127_v31 = vpop.f32.mrb[0].mxu0 }
 0x13f   :  { %v1149_v32 = vpop.f32.mrb[0].mxu1  ;;  %v1128_v34 = vpop.f32.mrb[1].mxu0 }
 0x140   :  { %v1150_v35 = vpop.f32.mrb[1].mxu1  ;;  %v1129_v36 = vadd.f32 %v1128_v34, %v1127_v31  ;;  %v1130_v38 = vpop.f32.mrb[2].mxu0 }
 0x141   :  { %v1151_v37 = vadd.f32 %v1150_v35, %v1149_v32  ;;  %v1152_v39 = vpop.f32.mrb[2].mxu1  ;;  %v1131_v40 = vpop.f32.mrb[3].mxu0 }
 0x142   :  { %v1153_v41 = vpop.f32.mrb[3].mxu1  ;;  %v651_v42 = vadd.f32 %v1129_v36, %v1027_v33 }
 0x144   :  { %v691_v43 = vadd.f32 %v1151_v37, %v651_v42 }
 0x15e   :  { %v1171_v44 = vpop.f32.mrb[4].mxu0 }
 0x15f   :  { %v1193_v45 = vpop.f32.mrb[4].mxu1  ;;  %v1172_v46 = vpop.f32.mrb[5].mxu0 }
 0x160   :  { %v1173_v47 = vadd.f32 %v1172_v46, %v1171_v44  ;;  %v1194_v48 = vpop.f32.mrb[5].mxu1  ;;  %v1174_v49 = vpop.f32.mrb[6].mxu0 }
 0x161   :  { %v1195_v50 = vadd.f32 %v1194_v48, %v1193_v45  ;;  %v1196_v51 = vpop.f32.mrb[6].mxu1  ;;  %v1175_v52 = vpop.f32.mrb[7].mxu0 }
 0x162   :  { %v731_v53 = vadd.f32 %v1173_v47, %v691_v43  ;;  %v1197_v54 = vpop.f32.mrb[7].mxu1 }
 0x164   :  { %v771_v55 = vadd.f32 %v1195_v50, %v731_v53 }
 0x166   :  { %v776_v56 = vmax.f32 %v771_v55, 0.0 }
 0x168   :  { %v777_v57 = vpack.c.bf16 %v776_v56, %v776_v56 }
 0x16a   :  { %1234 = vmatmul.mubr.bf16.vlgmr.msra.gmra.mrb[8].mxu0 %v777_v57 }
 0x23d   :  { %v883_v61 = vpop.f32.mrb[8].mxu0 }
 0x23e   :  { %v884_v62 = vadd.f32 %v1092_v60, %v883_v61  ;;  %v1235_v63 = vpop.f32.mrb[9].mxu0 }
 0x23f   :  { %v886_v0 = vpop.f32.mrb[10].mxu0 }
 0x240   :  { %v889_v1 = vmax.f32 %v884_v62, 0.0  ;;  %v1236_v2 = vpop.f32.mrb[11].mxu0 }
 0x242   :  { %v890_v3 = vpack.c.bf16 %v889_v1, %v889_v1 }
 0x244   :  { %1254 = vmatmul.mubr.bf16.vlgmr.msra.gmra.mrb[8].mxu1 %v890_v3 }
 0x317   :  { %v996_v5 = vpop.f32.mrb[8].mxu1 }
 0x318   :  { %v997_v6 = vadd.f32 %v1101_v4, %v996_v5  ;;  %v1255_v7 = vpop.f32.mrb[9].mxu1 }
 0x319   :  { %v999_v8 = vpop.f32.mrb[10].mxu1 }
 0x31a   :  { %v1110_v9 = vmul.f32 -1.442695, %v997_v6  ;;  %v1256_v10 = vpop.f32.mrb[11].mxu1 }
 0x31c   :  { %1346 = vpow2.f32 %v1110_v9 }
 0x326   :  { %v1347_v11 = vpop.eup %1346 }
 0x327   :  { %v1005_v12 = vadd.f32 1.0, %v1347_v11 }
 0x329   :  { %1348 = vrcp.f32 %v1005_v12 }
 0x333   :  { %v1349_v13 = vpop.eup %1348 }
 0x334   :  { %v1008_v14 = vpack.c.bf16 %v1349_v13, %v1349_v13 }
 0x336   :  { %1009 = vst [vmem:[#allocation10] sm:$0xf] %v1008_v14 }
 0x337   :  { %1449 = shalt.err (!%p1446_p8)
}
 0x338   :  { %s1450_s8 = scalar_lea.hbm %s1620_s7, 64 }
 0x339   :  { %p1451_p9 = scmp.ne.s32.totalorder %s1620_s7, %s1450_s8  ;;  %p1454_p10 = scmp.lt.u32.totalorder %s1450_s8, %s1620_s7 }
 0x33b   :  { %p1456_p11 = pnand %p1454_p10, %p1451_p9 }
 0x33d   :  { %1459 = shalt.err (!%p1456_p11)
}
 0x33e   :  { %1019 = dma.vmem_to_hbm [thread:$0]  %s1017_s28, 64, %s1620_s7, [#allocation4]  }
 0x33f   :  { %1466 = dma.done.wait [#allocation4], 64  }
 0x340   :  { %1467 = vsyncadd [#allocation4], 4294967232 }
 0x341   :  { %1023 = vsyncpa [#allocation3], 1 }
 0x342   :  { %1024 = vsyncpa [#allocation6], 1 }
 0x343   :  { %1025 = vsyncpa [#allocation9], 1 }
 0x344   :  { %1026 = vsyncpa [#allocation4], 1 }

</bundles_post_ra>
